<compile_context>
chip_gen: v7x
topology: tpu7x:2x2x1
jax: 0.10.0
libtpu: 0.0.40
codegen_flags: <defaults>
</compile_context>

<pallas_src>
import functools

import jax
import jax.numpy as jnp
from jax.experimental import pallas as pl
from jax.experimental.pallas import tpu as pltpu

GAMMA = 2.0
EPS = 1e-10

# Unroll the class loop (scalar-constant compares, no iota) for modest K;
# fall back to a vectorized reduce for large class counts (compile time).
_MAX_UNROLL_CLASSES = 32


def _focal_loss_kernel(preds_ref, tgt_ref, out_ref, acc_ref, *,
                       num_classes, hw, tile_s, blocks_per_split, n_blocks,
                       gamma, eps, needs_mask):
    c = pl.program_id(1)          # HW split index (feeds both TCs on v7x)
    j = pl.program_id(2)          # block index within this split

    @pl.when(j == 0)
    def _():
        acc_ref[...] = jnp.zeros_like(acc_ref)

    x = preds_ref[0].astype(jnp.float32)     # (K, tile_s, 128) dense slabs per class
    tgt = tgt_ref[0, 0]                      # (tile_s, 128) int32 class ids

    if num_classes <= _MAX_UNROLL_CLASSES:
        # Elementwise max across K dense slabs (no sublane/XLU reduction).
        m = x[0]
        for k in range(1, num_classes):
            m = jnp.maximum(m, x[k])
        # Single unrolled pass: sum-exp plus one-hot select of z_t against
        # scalar class constants (no per-step class iota); reuses z directly
        # so logp_t = z_t - lse needs no extra subtract of m.
        z0 = x[0] - m
        se = jnp.exp(z0)
        z_t = jnp.where(tgt == 0, z0, 0.0)
        for k in range(1, num_classes):
            zk = x[k] - m
            se = se + jnp.exp(zk)
            z_t = jnp.where(tgt == k, zk, z_t)
    else:
        m = jnp.max(x, axis=0)
        z = x - m[None]
        se = jnp.sum(jnp.exp(z), axis=0)
        kk = jax.lax.broadcasted_iota(jnp.int32, x.shape, 0)
        z_t = jnp.sum(jnp.where(kk == tgt[None], z, 0.0), axis=0)

    logp_t = z_t - jnp.log(se)               # (tile_s, 128)
    p_t = jnp.exp(logp_t)
    base = 1.0 - p_t + eps
    if gamma == 2.0:
        weight = base * base                 # exact; avoids pow (EUP log+exp)
    elif gamma == 1.0:
        weight = base
    else:
        weight = jnp.power(base, gamma)
    per_col = -weight * logp_t               # (tile_s, 128)

    if needs_mask:
        s_blk = c * blocks_per_split + j     # global HW-block index

        @pl.when(s_blk < n_blocks - 1)
        def _():
            acc_ref[...] += per_col          # common path: no mask cost

        @pl.when(s_blk == n_blocks - 1)
        def _():
            # Ragged tail only: select (not multiply) so garbage columns,
            # even NaN/inf, never reach the accumulator.
            row = jax.lax.broadcasted_iota(jnp.int32, (tile_s, 128), 0)
            lane = jax.lax.broadcasted_iota(jnp.int32, (tile_s, 128), 1)
            col = (s_blk * tile_s + row) * 128 + lane
            acc_ref[...] += jnp.where(col < hw, per_col, 0.0)
    else:
        acc_ref[...] += per_col

    @pl.when(j == blocks_per_split - 1)
    def _():
        # Single cross-lane reduce per (batch, split); accumulation above was
        # fully vectorized (shorter dependency chain, better accuracy).
        out_ref[...] = jnp.sum(acc_ref[...]).reshape(out_ref.shape)


def _choose_tile_s(s_total, num_classes, itemsize, max_block_bytes):
    """Largest s-tile whose (preds + target) block fits the byte budget.

    In the 4-D layout the blocks are sublane/lane dense, so the footprint per
    128-lane row is exactly (K*itemsize + 4) bytes * 128 -- no hidden (8,128)
    tiling padding to account for.
    """
    mult = 8 * max(1, 4 // itemsize)          # 8 rows f32, 16 rows bf16
    per_row = (num_classes * itemsize + 4) * 128
    tile_s = (max_block_bytes // per_row) // mult * mult
    tile_s = max(mult, tile_s)
    if tile_s >= s_total:
        return s_total                        # full dim is always legal
    return tile_s


def focal_loss(predictions, targets, gamma=GAMMA, eps=EPS,
               max_block_bytes=4 * 1024 * 1024):
    """predictions: (B, K, d1, d2, ...) logits; targets: (B, d1, d2, ...) ids."""
    B, K = predictions.shape[:2]
    preds = predictions.reshape(B, K, -1)     # free row-major reshape
    hw = preds.shape[-1]
    tgts = targets.reshape(B, -1).astype(jnp.int32)

    # Lane-align the spatial axis so the free split to (..., S, 128) works.
    hw_pad = ((hw + 127) // 128) * 128
    if hw_pad != hw:
        # Only hit when H*W isn't a multiple of 128; padded columns are
        # excluded inside the kernel via the tail mask.
        preds = jnp.pad(preds, ((0, 0), (0, 0), (0, hw_pad - hw)))
        tgts = jnp.pad(tgts, ((0, 0), (0, hw_pad - hw)))
    s_total = hw_pad // 128
    preds4 = preds.reshape(B, K, s_total, 128)    # free row-major split
    tgts4 = tgts.reshape(B, 1, s_total, 128)

    tile_s = _choose_tile_s(s_total, K, preds4.dtype.itemsize, max_block_bytes)
    n_blocks = pl.cdiv(s_total, tile_s)
    needs_mask = (n_blocks * tile_s * 128 != hw)

    # v7x: when B == 1 the batch axis alone can't feed both TensorCores, so
    # split the HW-block axis into a second "parallel" grid axis.  Size-1
    # (i.e. disabled) elsewhere; harmless on single-TC v5e/v6e.
    n_split = 2 if (B == 1 and n_blocks >= 2 and n_blocks % 2 == 0) else 1
    bps = n_blocks // n_split

    kernel = functools.partial(
        _focal_loss_kernel, num_classes=K, hw=hw, tile_s=tile_s,
        blocks_per_split=bps, n_blocks=n_blocks, gamma=gamma, eps=eps,
        needs_mask=needs_mask)

    # TODO(synk): add K-tiling (online softmax over class blocks) for very
    # large class counts where a single (K, tile_s, 128) block overflows VMEM.
    partials = pl.pallas_call(
        kernel,
        out_shape=jax.ShapeDtypeStruct((B, n_split, 1, 1), jnp.float32),
        grid_spec=pltpu.PrefetchScalarGridSpec(
            num_scalar_prefetch=0,
            grid=(B, n_split, bps),
            in_specs=[
                pl.BlockSpec((1, K, tile_s, 128),
                             lambda b, c, j: (b, 0, c * bps + j, 0)),
                pl.BlockSpec((1, 1, tile_s, 128),
                             lambda b, c, j: (b, 0, c * bps + j, 0)),
            ],
            out_specs=pl.BlockSpec((1, 1, 1, 1), lambda b, c, j: (b, c, 0, 0)),
            scratch_shapes=[pltpu.VMEM((tile_s, 128), jnp.float32)],
        ),
        compiler_params=pltpu.CompilerParams(
            dimension_semantics=("parallel", "parallel", "arbitrary")),
    )(preds4, tgts4)

    return jnp.sum(partials) / jnp.float32(B * hw)


def _focal_loss_ref(predictions, targets, gamma=GAMMA, eps=EPS):
    B, K = predictions.shape[:2]
    preds = jnp.moveaxis(predictions.reshape(B, K, -1), 1, -1).reshape(-1, K)
    tgts = targets.reshape(-1)
    logp = jax.nn.log_softmax(preds, axis=1)
    logp_t = jnp.take_along_axis(logp, tgts[:, None], axis=1)
    weight = jnp.power(1.0 - jnp.exp(logp_t) + eps, gamma)
    return jnp.mean(-weight * logp_t)


if __name__ == "__main__":
    key = jax.random.PRNGKey(0)
    k1, k2 = jax.random.split(key)
    B, C, H, W = 2, 4, 16, 16
    preds = jax.random.normal(k1, (B, C, H, W), dtype=jnp.float32)
    targets = jax.random.randint(k2, (B, H, W), 0, C, dtype=jnp.int32)

    loss = focal_loss(preds, targets)
    jax.block_until_ready(loss)

    ref = _focal_loss_ref(preds, targets)
    assert jnp.allclose(loss, ref, rtol=1e-5, atol=1e-6), (loss, ref)
    print("KERNEL_OK")
</pallas_src>

<mosaic_0001>
module attributes {stable_mosaic.version = 11 : i64} {
  func.func @_focal_loss_kernel(%arg0: i32, %arg1: i32, %arg2: i32, %arg3: memref<1x4x2x128xf32, #tpu.memory_space<vmem>>, %arg4: memref<1x1x2x128xi32, #tpu.memory_space<vmem>>, %arg5: memref<1x1x1x1xf32, #tpu.memory_space<vmem>>, %arg6: memref<2x128xf32, #tpu.memory_space<vmem>>) attributes {dimension_semantics = [#tpu.dimension_semantics<parallel>, #tpu.dimension_semantics<parallel>, #tpu.dimension_semantics<arbitrary>], iteration_bounds = array<i64: 2, 1, 1>, scalar_prefetch = 0 : i64, scratch_operands = 1 : i64, tpu.core_type = #tpu.core_type<tc>, window_params = [{transform_indices = @transform_0, window_bounds = array<i64: 1, 4, 2, 128>}, {transform_indices = @transform_1, window_bounds = array<i64: 1, 1, 2, 128>}, {transform_indices = @transform_2, window_bounds = array<i64: 1, 1, 1, 1>}]} {
    %c0_i32 = arith.constant 0 : i32
    %0 = arith.cmpi eq, %arg2, %c0_i32 : i32
    %1 = arith.extui %0 : i1 to i32
    %c0_i32_0 = arith.constant 0 : i32
    %2 = arith.cmpi ne, %1, %c0_i32_0 : i32
    scf.if %2 {
      %cst_18 = arith.constant 0.000000e+00 : f32
      %67 = vector.broadcast %cst_18 : f32 to vector<2x128xf32>
      %c0_19 = arith.constant 0 : index
      %c0_20 = arith.constant 0 : index
      %68 = vector.load %arg6[%c0_19, %c0_20] : memref<2x128xf32, #tpu.memory_space<vmem>>, vector<2x128xf32>
      tpu.vector_store %arg6[%c0_19, %c0_20], %67 {strides = array<i32>} : memref<2x128xf32, #tpu.memory_space<vmem>>, vector<2x128xf32>,
    } else {
    }
    %c0 = arith.constant 0 : index
    %c0_1 = arith.constant 0 : index
    %c0_2 = arith.constant 0 : index
    %c0_3 = arith.constant 0 : index
    %3 = vector.load %arg3[%c0, %c0_1, %c0_2, %c0_3] : memref<1x4x2x128xf32, #tpu.memory_space<vmem>>, vector<1x4x2x128xf32>
    %4 = vector.shape_cast %3 : vector<1x4x2x128xf32> to vector<4x2x128xf32>
    %c0_4 = arith.constant 0 : index
    %c0_5 = arith.constant 0 : index
    %c0_6 = arith.constant 0 : index
    %c0_7 = arith.constant 0 : index
    %5 = vector.load %arg4[%c0_4, %c0_5, %c0_6, %c0_7] : memref<1x1x2x128xi32, #tpu.memory_space<vmem>>, vector<1x1x2x128xi32>
    %6 = vector.shape_cast %5 : vector<1x1x2x128xi32> to vector<2x128xi32>
    %7 = vector.extract_strided_slice %4 {offsets = [0, 0, 0], sizes = [1, 2, 128], strides = [1, 1, 1]} : vector<4x2x128xf32> to vector<1x2x128xf32>
    %8 = vector.shape_cast %7 : vector<1x2x128xf32> to vector<2x128xf32>
    %9 = vector.extract_strided_slice %4 {offsets = [1, 0, 0], sizes = [1, 2, 128], strides = [1, 1, 1]} : vector<4x2x128xf32> to vector<1x2x128xf32>
    %10 = vector.shape_cast %9 : vector<1x2x128xf32> to vector<2x128xf32>
    %11 = arith.maximumf %8, %10 : vector<2x128xf32>
    %12 = vector.extract_strided_slice %4 {offsets = [2, 0, 0], sizes = [1, 2, 128], strides = [1, 1, 1]} : vector<4x2x128xf32> to vector<1x2x128xf32>
    %13 = vector.shape_cast %12 : vector<1x2x128xf32> to vector<2x128xf32>
    %14 = arith.maximumf %11, %13 : vector<2x128xf32>
    %15 = vector.extract_strided_slice %4 {offsets = [3, 0, 0], sizes = [1, 2, 128], strides = [1, 1, 1]} : vector<4x2x128xf32> to vector<1x2x128xf32>
    %16 = vector.shape_cast %15 : vector<1x2x128xf32> to vector<2x128xf32>
    %17 = arith.maximumf %14, %16 : vector<2x128xf32>
    %18 = vector.extract_strided_slice %4 {offsets = [0, 0, 0], sizes = [1, 2, 128], strides = [1, 1, 1]} : vector<4x2x128xf32> to vector<1x2x128xf32>
    %19 = vector.shape_cast %18 : vector<1x2x128xf32> to vector<2x128xf32>
    %20 = arith.subf %19, %17 : vector<2x128xf32>
    %21 = math.exp %20 : vector<2x128xf32>
    %c0_i32_8 = arith.constant 0 : i32
    %22 = vector.broadcast %c0_i32_8 : i32 to vector<2x128xi32>
    %23 = arith.cmpi eq, %6, %22 : vector<2x128xi32>
    %cst = arith.constant 0.000000e+00 : f32
    %24 = vector.broadcast %cst : f32 to vector<2x128xf32>
    %25 = arith.select %23, %20, %24 : vector<2x128xi1>, vector<2x128xf32>
    %26 = vector.extract_strided_slice %4 {offsets = [1, 0, 0], sizes = [1, 2, 128], strides = [1, 1, 1]} : vector<4x2x128xf32> to vector<1x2x128xf32>
    %27 = vector.shape_cast %26 : vector<1x2x128xf32> to vector<2x128xf32>
    %28 = arith.subf %27, %17 : vector<2x128xf32>
    %29 = math.exp %28 : vector<2x128xf32>
    %30 = arith.addf %21, %29 : vector<2x128xf32>
    %c1_i32 = arith.constant 1 : i32
    %31 = vector.broadcast %c1_i32 : i32 to vector<2x128xi32>
    %32 = arith.cmpi eq, %6, %31 : vector<2x128xi32>
    %33 = arith.select %32, %28, %25 : vector<2x128xi1>, vector<2x128xf32>
    %34 = vector.extract_strided_slice %4 {offsets = [2, 0, 0], sizes = [1, 2, 128], strides = [1, 1, 1]} : vector<4x2x128xf32> to vector<1x2x128xf32>
    %35 = vector.shape_cast %34 : vector<1x2x128xf32> to vector<2x128xf32>
    %36 = arith.subf %35, %17 : vector<2x128xf32>
    %37 = math.exp %36 : vector<2x128xf32>
    %38 = arith.addf %30, %37 : vector<2x128xf32>
    %c2_i32 = arith.constant 2 : i32
    %39 = vector.broadcast %c2_i32 : i32 to vector<2x128xi32>
    %40 = arith.cmpi eq, %6, %39 : vector<2x128xi32>
    %41 = arith.select %40, %36, %33 : vector<2x128xi1>, vector<2x128xf32>
    %42 = vector.extract_strided_slice %4 {offsets = [3, 0, 0], sizes = [1, 2, 128], strides = [1, 1, 1]} : vector<4x2x128xf32> to vector<1x2x128xf32>
    %43 = vector.shape_cast %42 : vector<1x2x128xf32> to vector<2x128xf32>
    %44 = arith.subf %43, %17 : vector<2x128xf32>
    %45 = math.exp %44 : vector<2x128xf32>
    %46 = arith.addf %38, %45 : vector<2x128xf32>
    %c3_i32 = arith.constant 3 : i32
    %47 = vector.broadcast %c3_i32 : i32 to vector<2x128xi32>
    %48 = arith.cmpi eq, %6, %47 : vector<2x128xi32>
    %49 = arith.select %48, %44, %41 : vector<2x128xi1>, vector<2x128xf32>
    %50 = math.log %46 : vector<2x128xf32>
    %51 = arith.subf %49, %50 : vector<2x128xf32>
    %52 = math.exp %51 : vector<2x128xf32>
    %cst_9 = arith.constant 1.000000e+00 : f32
    %53 = vector.broadcast %cst_9 : f32 to vector<2x128xf32>
    %54 = arith.subf %53, %52 : vector<2x128xf32>
    %cst_10 = arith.constant 1.000000e-10 : f32
    %55 = vector.broadcast %cst_10 : f32 to vector<2x128xf32>
    %56 = arith.addf %54, %55 : vector<2x128xf32>
    %57 = arith.mulf %56, %56 : vector<2x128xf32>
    %cst_11 = arith.constant 0.000000e+00 : f32
    %58 = vector.broadcast %cst_11 : f32 to vector<2x128xf32>
    %59 = arith.subf %58, %57 : vector<2x128xf32>
    %60 = arith.mulf %59, %51 : vector<2x128xf32>
    %c0_12 = arith.constant 0 : index
    %c0_13 = arith.constant 0 : index
    %61 = vector.load %arg6[%c0_12, %c0_13] : memref<2x128xf32, #tpu.memory_space<vmem>>, vector<2x128xf32>
    %62 = arith.addf %61, %60 : vector<2x128xf32>
    %c0_14 = arith.constant 0 : index
    %c0_15 = arith.constant 0 : index
    %63 = vector.load %arg6[%c0_14, %c0_15] : memref<2x128xf32, #tpu.memory_space<vmem>>, vector<2x128xf32>
    tpu.vector_store %arg6[%c0_14, %c0_15], %62 {strides = array<i32>} : memref<2x128xf32, #tpu.memory_space<vmem>>, vector<2x128xf32>,
    %c0_i32_16 = arith.constant 0 : i32
    %64 = arith.cmpi eq, %arg2, %c0_i32_16 : i32
    %65 = arith.extui %64 : i1 to i32
    %c0_i32_17 = arith.constant 0 : i32
    %66 = arith.cmpi ne, %65, %c0_i32_17 : i32
    scf.if %66 {
      %c0_18 = arith.constant 0 : index
      %c0_19 = arith.constant 0 : index
      %67 = vector.load %arg6[%c0_18, %c0_19] : memref<2x128xf32, #tpu.memory_space<vmem>>, vector<2x128xf32>
      %68 = vector.shape_cast %67 : vector<2x128xf32> to vector<1x2x128xf32>
      %cst_20 = arith.constant dense<0.000000e+00> : vector<1xf32>
      %69 = vector.multi_reduction <add>, %68, %cst_20 [1, 2] : vector<1x2x128xf32> to vector<1xf32>
      %70 = vector.shape_cast %69 : vector<1xf32> to vector<1x1x1xf32>
      %71 = vector.extract %70[0, 0, 0] : f32 from vector<1x1x1xf32>
      %72 = vector.broadcast %71 : f32 to vector<1x1x1x1xf32>
      %c0_21 = arith.constant 0 : index
      %c0_22 = arith.constant 0 : index
      %c0_23 = arith.constant 0 : index
      %c0_24 = arith.constant 0 : index
      %73 = vector.load %arg5[%c0_21, %c0_22, %c0_23, %c0_24] : memref<1x1x1x1xf32, #tpu.memory_space<vmem>>, vector<1x1x1x1xf32>
      tpu.vector_store %arg5[%c0_21, %c0_22, %c0_23, %c0_24], %72 {strides = array<i32>} : memref<1x1x1x1xf32, #tpu.memory_space<vmem>>, vector<1x1x1x1xf32>,
    } else {
    }
    return
  }
  func.func @transform_0(%arg0: i32, %arg1: i32, %arg2: i32) -> (i32, i32, i32, i32) {
    %c1_i32 = arith.constant 1 : i32
    %0 = arith.muli %arg1, %c1_i32 : i32
    %1 = arith.addi %0, %arg2 : i32
    %c0_i32 = arith.constant 0 : i32
    %c0_i32_0 = arith.constant 0 : i32
    %c0_i32_1 = arith.constant 0 : i32
    return %arg0, %c0_i32, %1, %c0_i32_0 : i32, i32, i32, i32
  }
  func.func @transform_1(%arg0: i32, %arg1: i32, %arg2: i32) -> (i32, i32, i32, i32) {
    %c1_i32 = arith.constant 1 : i32
    %0 = arith.muli %arg1, %c1_i32 : i32
    %1 = arith.addi %0, %arg2 : i32
    %c0_i32 = arith.constant 0 : i32
    %c0_i32_0 = arith.constant 0 : i32
    %c0_i32_1 = arith.constant 0 : i32
    return %arg0, %c0_i32, %1, %c0_i32_0 : i32, i32, i32, i32
  }
  func.func @transform_2(%arg0: i32, %arg1: i32, %arg2: i32) -> (i32, i32, i32, i32) {
    %c0_i32 = arith.constant 0 : i32
    %c0_i32_0 = arith.constant 0 : i32
    %c0_i32_1 = arith.constant 0 : i32
    return %arg0, %arg1, %c0_i32, %c0_i32_0 : i32, i32, i32, i32
  }
}

</mosaic_0001>

<bundles_post_ra>
// kernel: tpu_custom_call.1
= control target key start
LH: loop header
LB: loop body
LE: loop exit
PB: predicated region body
PF: predicated region fallthrough
CT: control target
= control target key end

     0   :  { %7 = vsyncpa [#allocation4], 0  ;;  %s805_s0 = inlined_call_operand.hbm [shape: f32[2,4,2,128], index: 0, kind: input, shape index: {}]   ;;  %s806_s1 = inlined_call_operand.hbm [shape: s32[2,1,2,128], index: 1, kind: input, shape index: {}]   ;;  %s807_s2 = inlined_call_operand.vmem [shape: f32[2,1,1,1], index: 2, kind: output, shape index: {}]  }
   0x1   :  { %9 = vsyncpa [#allocation4 + $0x1], 0 }
   0x2   :  { %10 = vsyncpa [#allocation6], 0 }
   0x3   :  { %12 = vsyncpa [#allocation6 + $0x1], 0  ;;  %s641_s9 = smov 0   ;;  %s643_s10 = smov 0  }
   0x4   :  { %s645_s11 = smov 0   ;;  %s647_s12 = smov 0  }
   0x5   :  { %s649_s13 = smov 0   ;;  %s651_s14 = smov 0  }
   0x6 LB: > { %s413_s15 = sadd.s32 4294967295, %s619_s14   ;;  %s37_s16 = sadd.s32 1, %s615_s13  ;;  %s619_s14 = sphi %s651_s14, %s18_s14   ;;  %s615_s13 = sphi %s649_s13, %s819_s13   ;;  %s611_s12 = sphi %s647_s12, %s818_s12   ;;  %s607_s11 = sphi %s645_s11, %s817_s11   ;;  %s603_s10 = sphi %s643_s10, %s816_s10   ;;  %s599_s9 = sphi %s641_s9, %s815_s9  }
   0x7   : > { %p39_p0 = scmp.ge.s32.totalorder %s37_s16, 2  ;;  %s48_s17 = sadd.s32 1, %s607_s11 }
   0x8   : > { %p55_p1 = scmp.ne.s32.totalorder %s607_s11, %s603_s10  ;;  %p56_p2 = scmp.eq.s32.totalorder %s619_s14, 0 }
   0x9   : > { %s821_s16 = smov (%p39_p0, %s37_s16), 0  ;;  %p61_p4 = scmp.ne.s32.totalorder %s603_s10, %s599_s9 }
   0xa   : > { %p677_p3 = por %p56_p2, %p55_p1  ;;  %s43_s19 = ssub.s32 %s615_s13, %s821_s16 }
   0xb   : > { %p62_p5 = scmp.eq.s32.totalorder %s413_s15, 0  ;;  %p46_p6 = scmp.eq.s32.totalorder %s43_s19, 0 }
   0xc   : > { %p441_p8 = scmp.lt.s32.totalorder %s619_s14, 2  ;;  %s693_s22 = sand.u32 1, %s607_s11  }
   0xd   : > { %p684_p7 = por %p62_p5, %p61_p4  ;;  %s427_s23 = sshll.u32 %s615_s13, 7 }
   0xe   : > { %s690_s21 = scalar_select %p46_p6, %s607_s11, %s48_s17  }
   0xf   : > { %s810_s20 = scalar_select %p684_p7, 1, 0 }
  0x10   : > { %s417_s24 = sshll.u32 %s693_s22, 3  ;;  %s700_s27 = scalar_lea.hbm %s805_s0, %s427_s23 }
  0x11   : > { %s147_s28 = scalar_lea.vmem [#allocation3], %s417_s24  ;;  %p704_p9 = pnand %p441_p8, %p677_p3 }
  0x12   : > { %s156_s29 = sshll.u32 %s147_s28, 4  ;;  %s144_s3 = scalar_lea.sflag [#allocation4], %s693_s22  ;;  %s708_s29 = int_to_ptr.vmem [resolvable:$true] %s156_s29 }
  0x13   : > { %s505_s4 = scalar_lea.hbm %s700_s27, 128  ;;  %p507_p11 = pneg %p704_p9 }
  0x14   : > { %p506_p10 = scmp.ne.s32.totalorder %s700_s27, %s505_s4  ;;  %s510_s7 = scalar_lea.hbm %s805_s0, 256 }
  0x15   : > { %p511_p0 = scmp.lt.u32.totalorder %s700_s27, %s805_s0  ;;  %p512_p1 = scmp.lt.u32.totalorder %s510_s7, %s505_s4 }
  0x16   : > { %p508_p12 = pnand %p507_p11, %p506_p10  ;;  %p514_p3 = scmp.lt.u32.totalorder %s505_s4, %s700_s27 }
  0x17   : > { %p513_p2 = por %p512_p1, %p511_p0 }
  0x18   : > { %p509_p13 = pneg %p508_p12 }
  0x19   : > { %p515_p4 = por %p514_p3, %p513_p2 }
  0x1b   : > { %p516_p5 = pnand %p515_p4, %p509_p13 }
  0x1d   : > { %519 = shalt.err (!%p516_p5)
}
  0x1e   : > { %s520_s15 = scalar_lea.vmem %s708_s29, 128  ;;  %s621_s17 = smov [#allocation3]  }
  0x1f   : > { %p521_p6 = scmp.ne.s32.totalorder %s708_s29, %s520_s15  ;;  %s525_s18 = sshll.u32 %s621_s17, 4  ;;  %s526_s18 = int_to_ptr.vmem [resolvable:$false] %s525_s18 }
  0x20   : > { %s527_s19 = scalar_lea.vmem %s526_s18, 256  ;;  %p528_p12 = scmp.lt.s32.totalorder %s708_s29, %s526_s18 }
  0x21   : > { %p523_p8 = pnand %p521_p6, %p507_p11  ;;  %p529_p0 = scmp.lt.s32.totalorder %s527_s19, %s520_s15 }
  0x23   : > { %p524_p10 = pneg %p523_p8  ;;  %p530_p1 = por %p529_p0, %p528_p12 }
  0x25   : > { %p531_p2 = pnand %p530_p1, %p524_p10 }
  0x27   : > { %534 = shalt.err (!%p531_p2)
}
  0x28   : > { %s622_s23 = smov 32   ;;  %s623_s24 = smov 2  }
  0x29   : > { %437 = dma.hbm_to_vmem [thread:$0]  (!%p704_p9), %s700_s27, 128, %s708_s29, %s144_s3, %s622_s23, %s622_s23, %s623_s24  }
  0x2a   : > { %p422_p13 = scmp.ge.s32.totalorder %s619_s14, 1  ;;  %p184_p3 = scmp.lt.s32.totalorder %s619_s14, 3 }
  0x2b   : > { %s420_s25 = sshll.u32 %s693_s22, 1  ;;  %s421_s28 = sshll.u32 %s615_s13, 5 }
  0x2c   : > { %p741_p4 = pnand %p422_p13, %p184_p3  ;;  %s170_s4 = scalar_lea.vmem [#allocation5], %s420_s25 }
  0x2d   : > { %s179_s5 = sshll.u32 %s170_s4, 4  ;;  %s749_s8 = scalar_lea.hbm %s806_s1, %s421_s28  ;;  %s180_s5 = int_to_ptr.vmem [resolvable:$true] %s179_s5 }
  0x2e   : > { %s812_s26 = scalar_select %p741_p4, 1, 0 }
  0x2f   : > { %s167_s27 = scalar_lea.sflag [#allocation6], %s693_s22  ;;  %s535_s29 = scalar_lea.hbm %s749_s8, 32 }
  0x30   : > { %p536_p5 = scmp.ne.s32.totalorder %s749_s8, %s535_s29  ;;  %s540_s15 = scalar_lea.hbm %s806_s1, 64 }
  0x31   : > { %p541_p10 = scmp.lt.u32.totalorder %s749_s8, %s806_s1  ;;  %p542_p12 = scmp.lt.u32.totalorder %s540_s15, %s535_s29 }
  0x32   : > { %p538_p6 = pnand %p536_p5, %p507_p11  ;;  %p544_p1 = scmp.lt.u32.totalorder %s535_s29, %s749_s8 }
  0x33   : > { %p543_p0 = por %p542_p12, %p541_p10 }
  0x34   : > { %p539_p8 = pneg %p538_p6 }
  0x35   : > { %p545_p2 = por %p544_p1, %p543_p0 }
  0x37   : > { %p546_p13 = pnand %p545_p2, %p539_p8 }
  0x39   : > { %549 = shalt.err (!%p546_p13)
}
  0x3a   : > { %s550_s22 = scalar_lea.vmem %s180_s5, 32  ;;  %s624_s19 = smov [#allocation5]  }
  0x3b   : > { %p551_p3 = scmp.ne.s32.totalorder %s180_s5, %s550_s22  ;;  %s555_s23 = sshll.u32 %s624_s19, 4  ;;  %s556_s23 = int_to_ptr.vmem [resolvable:$false] %s555_s23 }
  0x3c   : > { %s557_s24 = scalar_lea.vmem %s556_s23, 64  ;;  %p558_p7 = scmp.lt.s32.totalorder %s180_s5, %s556_s23 }
  0x3d   : > { %p553_p5 = pnand %p551_p3, %p507_p11  ;;  %p559_p4 = scmp.lt.s32.totalorder %s557_s24, %s550_s22 }
  0x3f   : > { %p554_p6 = pneg %p553_p5  ;;  %p560_p10 = por %p559_p4, %p558_p7 }
  0x41   : > { %p561_p12 = pnand %p560_p10, %p554_p6 }
  0x43   : > { %564 = shalt.err (!%p561_p12)
}
  0x44   : > { %440 = dma.hbm_to_vmem [thread:$0]  (!%p704_p9), %s749_s8, 32, %s180_s5, %s167_s27  }
  0x45   : > { %p813_p8 = scmp.ne.s32.totalorder %s812_s26, 0 }
  0x46   : > { %s190_s25 = sand.u32 (!%p813_p8), 1, %s603_s10   ;;  %p814_p11 = scmp.ne.s32.totalorder (!%p813_p8), %s810_s20, 0 }
  0x47   : > { %188 = sbr.rel (%p813_p8) target bundleno = 366 (0x16e), region = 28  ;;  %s423_s28 = sshll.u32 (!%p813_p8), %s190_s25, 3 }
  0x48   : > { %s191_s4 = scalar_lea.sflag (!%p813_p8), [#allocation4], %s190_s25  ;;  %s194_s6 = scalar_lea.vmem (!%p813_p8), [#allocation3], %s423_s28 }
  0x4e   : > { %590 = dma.done.wait (%p814_p11), %s191_s4, 128  }
  0x4f   : > { %592 = vsyncadd (%p814_p11), %s191_s4, 4294967168  ;;  %s424_s7 = sshll.u32 %s190_s25, 1  ;;  %s200_s29 = scalar_lea.sflag [#allocation6], %s190_s25 }
  0x50   : > { %s203_s30 = scalar_lea.vmem [#allocation5], %s424_s7 }
  0x51   : > { %594 = dma.done.wait (%p814_p11), %s200_s29, 32  }
  0x52   : > { %596 = vsyncadd (%p814_p11), %s200_s29, 4294967264  ;;  %v625_v0 = vmov 0.0   ;;  %v243_v1 = vld [vmem:[%s194_s6] sm:$0x3]  ;;  %v244_v2 = vld [vmem:[%s194_s6 + $0x2] sm:$0x3] }
  0x53   : > { %242 = vst [vmem:[#allocation2] sm:$0x3] %v625_v0  ;;  %v245_v3 = vld [vmem:[%s194_s6 + $0x4] sm:$0x3]  ;;  %v248_v4 = vmax.f32 %v243_v1, %v244_v2  ;;  %v246_v5 = vld [vmem:[%s194_s6 + $0x6] sm:$0x3] }
  0x54   : > { %v247_v21 = vld [vmem:[%s203_s30] sm:$0x3]  ;;  %vm291_vm4 = vcmask 1041408   ;;  %p232_p7 = scmp.lt.s32.totalorder %s611_s12, 1  ;;  %vm303_vm5 = vcmask 0  }
  0x55   : > { %v249_v6 = vmax.f32 %v248_v4, %v245_v3  ;;  %vm254_vm0 = vcmp.eq.s32.totalorder %v247_v21, 0  ;;  %vm260_vm1 = vcmp.eq.s32.totalorder %v247_v21, 1  ;;  %vm266_vm2 = vcmp.eq.s32.totalorder %v247_v21, 2 }
  0x56   : > { %vm272_vm3 = vcmp.eq.s32.totalorder %v247_v21, 3  ;;  %s823_s12 = smov (!%p232_p7, %s611_s12), 1 }
  0x57   : > { %v250_v7 = vmax.f32 %v249_v6, %v246_v5  ;;  %s237_s5 = scalar_lea.vmem %s807_s2, %s823_s12 }
  0x59   : > { %v251_v8 = vsub.f32 %v243_v1, %v250_v7  ;;  %v256_v9 = vsub.f32 %v244_v2, %v250_v7  ;;  %v262_v10 = vsub.f32 %v245_v3, %v250_v7  ;;  %v268_v11 = vsub.f32 %v246_v5, %v250_v7 }
  0x5a   : > { %v284_v37 = vld [vmem:[#allocation2] sm:$0x3] }
  0x5b   : > { %v252_v12 = vmul.f32 1.442695, %v251_v8  ;;  %v257_v13 = vmul.f32 1.442695, %v256_v9  ;;  %v263_v14 = vmul.f32 1.442695, %v262_v10 }
  0x5c   : > { %v269_v15 = vmul.f32 1.442695, %v268_v11  ;;  %v255_v24 = vsel %vm254_vm0, %v251_v8, 0.0 }
  0x5d   : > { %493 = vpow2.f32 %v252_v12  ;;  %v261_v25 = vsel %vm260_vm1, %v256_v9, %v255_v24 }
  0x5e   : > { %495 = vpow2.f32 %v257_v13  ;;  %v267_v26 = vsel %vm266_vm2, %v262_v10, %v261_v25 }
  0x5f   : > { %497 = vpow2.f32 %v263_v14  ;;  %v273_v28 = vsel %vm272_vm3, %v268_v11, %v267_v26 }
  0x60   : > { %499 = vpow2.f32 %v269_v15 }
  0x67   : > { %v494_v16 = vpop.eup %493 }
  0x68   : > { %v496_v17 = vpop.eup %495 }
  0x69   : > { %v498_v18 = vpop.eup %497  ;;  %v259_v19 = vadd.f32 %v496_v17, %v494_v16 }
  0x6a   : > { %v500_v20 = vpop.eup %499 }
  0x6b   : > { %v265_v22 = vadd.f32 %v498_v18, %v259_v19 }
  0x6d   : > { %v271_v23 = vadd.f32 %v500_v20, %v265_v22 }
  0x6f   : > { %501 = vlog2.f32 %v271_v23 }
  0x79   : > { %v502_v27 = vpop.eup %501 }
  0x7a   : > { %v275_v29 = vmul.f32 0.6931472, %v502_v27 }
  0x7c   : > { %v276_v30 = vsub.f32 %v273_v28, %v275_v29 }
  0x7e   : > { %v277_v31 = vmul.f32 1.442695, %v276_v30 }
  0x80   : > { %503 = vpow2.f32 %v277_v31 }
  0x8a   : > { %v504_v32 = vpop.eup %503 }
  0x8b   : > { %v279_v33 = vsub.f32 1.0, %v504_v32 }
  0x8d   : > { %v280_v34 = vadd.f32 1e-10, %v279_v33 }
  0x8f   : > { %v281_v35 = vmul.f32 %v280_v34, %v280_v34 }
  0x91   : > { %v282_v36 = vsub.f32 0.0, %v281_v35 }
  0x93   : > { %v283_v38 = vmul.f32 %v282_v36, %v276_v30 }
  0x95   : > { %v285_v39 = vadd.f32 %v284_v37, %v283_v38 }
  0x97   : > { %286 = vst [vmem:[#allocation2] sm:$0x3] %v285_v39 }
  0x9e   : > { %v290_v40 = vld [vmem:[#allocation2] sm:$0x3] }
  0x9f   : > { %v292_v41 = vsel %vm291_vm4, %v290_v40, 0.0 }
  0xa0   : > { %293 = vadd.xlane.f32.xlu0 %v292_v41 }
 0x12d   : > { %v294_v42 = vpop.xlane.xlu0 %293 }
 0x12e   : > { %v295_v43 = vrot.slane %v294_v42, 4 }
 0x130   : > { %v296_v44 = vadd.f32 %v295_v43, %v294_v42 }
 0x132   : > { %v297_v45 = vrot.slane %v296_v44, 2 }
 0x134   : > { %v298_v46 = vadd.f32 %v297_v45, %v296_v44 }
 0x136   : > { %v299_v47 = vrot.slane %v298_v46, 1 }
 0x138   : > { %v300_v48 = vadd.f32 %v299_v47, %v298_v46 }
 0x13a   : > { %428 = vpush %v300_v48 }
 0x16b   : > { %s429_s8 = spop %428 }
 0x16c   : > { %v302_v49 = vstv %s429_s8 }
 0x16d   : > { %304 = vst.msk [vmem:[%s237_s5] sm:$0x1] %vm303_vm5, %v302_v49 }
 0x16e PF: > { %s18_s14 = sadd.s32 1, %s619_s14   ;;  %s815_s9 = smov %s603_s10 }
 0x16f   : > { %p15_p9 = scmp.ge.s32.totalorder %s18_s14, 4   ;;  %s816_s10 = smov %s607_s11 }
 0x170   : > { %s817_s11 = smov %s690_s21  ;;  %s818_s12 = smov %s615_s13 }
 0x171   : > { %s819_s13 = smov %s821_s16  ;;  %17 = sbr.rel (!%p15_p9) target bundleno = 6 (0x6), region = 89 }
 0x178   :  { %328 = vsyncpa [#allocation4], 1 }
 0x179   :  { %330 = vsyncpa [#allocation4 + $0x1], 1 }
 0x17a   :  { %331 = vsyncpa [#allocation6], 1 }
 0x17b   :  { %333 = vsyncpa [#allocation6 + $0x1], 1 }

</bundles_post_ra>
